<compile_context>
chip_gen: v6e
topology: v6e:2x2x1
jax: 0.10.0
libtpu: 0.0.40
codegen_flags: <defaults>
</compile_context>

<pallas_src>
import jax
import jax.numpy as jnp
from jax.experimental import pallas as pl
from jax.experimental.pallas import tpu as pltpu

H1, H2, H3 = 256, 128, 64   # hidden sizes from the PyTorch module
H3_PAD = 128                # fc3 output / fc4 input padded to a full lane width
LANE = 128


def _round_up(n, m):
    return ((n + m - 1) // m) * m


def _mlp_kernel(x_ref, w1_ref, b1_ref, w2_ref, b2_ref, w3_ref, b3_ref,
                w4_ref, b4_ref, o_ref):
    # bf16 operands feed the MXU; f32 accumulate, f32 bias + ReLU on the VPU.
    # Casts are fused immediately before each dot so they hide under vmatmul.
    h = jnp.dot(x_ref[...].astype(jnp.bfloat16), w1_ref[...],
                preferred_element_type=jnp.float32) + b1_ref[...]
    h = jnp.maximum(h, 0.0)
    h = jnp.dot(h.astype(jnp.bfloat16), w2_ref[...],
                preferred_element_type=jnp.float32) + b2_ref[...]
    h = jnp.maximum(h, 0.0)
    h = jnp.dot(h.astype(jnp.bfloat16), w3_ref[...],
                preferred_element_type=jnp.float32) + b3_ref[...]
    h = jnp.maximum(h, 0.0)
    o_ref[...] = (jnp.dot(h.astype(jnp.bfloat16), w4_ref[...],
                          preferred_element_type=jnp.float32)
                  + b4_ref[...]).astype(o_ref.dtype)


def _choose_batch_tile(B, batch_tile):
    """Pick a multiple-of-16 batch tile; guarantee >=2 grid steps when possible.

    bf16 vregs pack 16 sublanes, so bt % 16 == 0 avoids half-packed sublane
    pairs before each vmatmul.  If the whole (16-padded) batch would fit in a
    single tile but is large enough to split, halve the tile so grid >= 2 and
    the second v7x TensorCore gets work (harmless ~0.35 us on 1-TC chips).
    """
    b16 = _round_up(B, 16)
    bt = min(_round_up(batch_tile, 16), b16)
    if bt >= b16 and b16 >= 32:
        bt = _round_up(b16 // 2, 16)
    b_pad = _round_up(B, bt)
    return bt, b_pad


def mahjong_dqn_forward(x, params, output_dim, *, batch_tile=1024,
                        out_dtype=jnp.float32):
    """x: (B, input_dim) float32. params: kernel-ready (padded/transposed) dict."""
    B, in_dim = x.shape
    in_pad = params["w1"].shape[0]
    out_pad = params["w4"].shape[1]

    # Lane-dense fc1 LHS: pad the feature dim only if needed (w1 has zero rows
    # for the padded columns, so results are unchanged).
    if in_dim != in_pad:
        x = jnp.pad(x, ((0, 0), (0, in_pad - in_dim)))

    bt, b_pad = _choose_batch_tile(B, batch_tile)
    if b_pad != B:
        x = jnp.pad(x, ((0, b_pad - B), (0, 0)))
    grid = (b_pad // bt,)

    const = lambda i: (0, 0)  # weights / biases: same block every grid step

    flops = 2 * b_pad * (in_pad * H1 + H1 * H2 + H2 * H3_PAD + H3_PAD * out_pad)
    bytes_accessed = int(
        b_pad * in_pad * x.dtype.itemsize
        + b_pad * out_pad * jnp.dtype(out_dtype).itemsize
        + sum(int(params[k].size) * params[k].dtype.itemsize
              for k in ("w1", "b1", "w2", "b2", "w3", "b3", "w4", "b4")))

    out = pl.pallas_call(
        _mlp_kernel,
        out_shape=jax.ShapeDtypeStruct((b_pad, out_pad), out_dtype),
        grid_spec=pltpu.PrefetchScalarGridSpec(
            num_scalar_prefetch=0,
            grid=grid,
            in_specs=[
                pl.BlockSpec((bt, in_pad), lambda i: (i, 0)),
                pl.BlockSpec((in_pad, H1), const),
                pl.BlockSpec((1, H1), const),
                pl.BlockSpec((H1, H2), const),
                pl.BlockSpec((1, H2), const),
                pl.BlockSpec((H2, H3_PAD), const),
                pl.BlockSpec((1, H3_PAD), const),
                pl.BlockSpec((H3_PAD, out_pad), const),
                pl.BlockSpec((1, out_pad), const),
            ],
            out_specs=pl.BlockSpec((bt, out_pad), lambda i: (i, 0)),
        ),
        compiler_params=pltpu.CompilerParams(
            dimension_semantics=("parallel",)),
        cost_estimate=pl.CostEstimate(flops=flops, transcendentals=0,
                                      bytes_accessed=bytes_accessed),
    )(x, params["w1"], params["b1"], params["w2"], params["b2"],
      params["w3"], params["b3"], params["w4"], params["b4"])

    # Strip batch padding and the lane-padding of the action head.
    return out[:B, :output_dim]


def init_params_pt(key, input_dim, output_dim):
    """Deterministic synthetic init in PyTorch nn.Linear layout: w (out, in), b (out,)."""
    dims = [(input_dim, H1), (H1, H2), (H2, H3), (H3, output_dim)]
    params = {}
    keys = jax.random.split(key, 2 * len(dims))
    for idx, (d_in, d_out) in enumerate(dims):
        bound = 1.0 / jnp.sqrt(d_in)
        params[f"w{idx + 1}"] = jax.random.uniform(
            keys[2 * idx], (d_out, d_in), minval=-bound, maxval=bound,
            dtype=jnp.float32)
        params[f"b{idx + 1}"] = jax.random.uniform(
            keys[2 * idx + 1], (d_out,), minval=-bound, maxval=bound,
            dtype=jnp.float32)
    return params


def prepare_params(pt, input_dim, output_dim):
    """PyTorch layout -> kernel layout: transpose, zero-pad to lane widths, bf16 weights.

    Correctness of the padded H3/output lanes relies on the bias padding being
    exactly zero (and ReLU(0) == 0); assert it so a future init change can't
    silently leak padded lanes into real outputs.
    """
    in_pad = _round_up(input_dim, LANE)
    out_pad = _round_up(output_dim, LANE)

    def pad_to(a, shape):
        return jnp.pad(a, [(0, s - d) for d, s in zip(a.shape, shape)])

    params = {
        "w1": pad_to(pt["w1"].T, (in_pad, H1)).astype(jnp.bfloat16),
        "b1": pt["b1"].reshape(1, H1).astype(jnp.float32),
        "w2": pt["w2"].T.astype(jnp.bfloat16),
        "b2": pt["b2"].reshape(1, H2).astype(jnp.float32),
        "w3": pad_to(pt["w3"].T, (H2, H3_PAD)).astype(jnp.bfloat16),
        "b3": pad_to(pt["b3"].reshape(1, H3), (1, H3_PAD)).astype(jnp.float32),
        "w4": pad_to(pt["w4"].T, (H3_PAD, out_pad)).astype(jnp.bfloat16),
        "b4": pad_to(pt["b4"].reshape(1, output_dim), (1, out_pad)).astype(jnp.float32),
    }
    assert bool(jnp.all(params["b3"][:, H3:] == 0.0)), "b3 padding must be zero"
    assert bool(jnp.all(params["b4"][:, output_dim:] == 0.0)), "b4 padding must be zero"
    return params


def reference_forward(x, pt):
    """Pure-JAX reference matching the kernel's bf16-operand / f32-accumulate math."""
    def lin(h, w, b):
        return jnp.dot(h.astype(jnp.bfloat16), w.T.astype(jnp.bfloat16),
                       preferred_element_type=jnp.float32) + b
    h = jnp.maximum(lin(x, pt["w1"], pt["b1"]), 0.0)
    h = jnp.maximum(lin(h, pt["w2"], pt["b2"]), 0.0)
    h = jnp.maximum(lin(h, pt["w3"], pt["b3"]), 0.0)
    return lin(h, pt["w4"], pt["b4"])


if __name__ == "__main__":
    key = jax.random.PRNGKey(0)
    kx, kp = jax.random.split(key)

    # Small shapes consistent with the module: Mahjong state vector -> 34 actions.
    batch, input_dim, output_dim = 32, 128, 34

    x = jax.random.normal(kx, (batch, input_dim), dtype=jnp.float32)
    pt_params = init_params_pt(kp, input_dim, output_dim)
    params = prepare_params(pt_params, input_dim, output_dim)

    out = mahjong_dqn_forward(x, params, output_dim)
    out = jax.block_until_ready(out)

    ref = reference_forward(x, pt_params)
    assert out.shape == (batch, output_dim)
    assert jnp.allclose(out, ref, atol=2e-2, rtol=2e-2), "mismatch vs reference"

    print("KERNEL_OK")
</pallas_src>

<mosaic_0001>
module attributes {stable_mosaic.version = 11 : i64} {
  func.func @_mlp_kernel(%arg0: i32, %arg1: memref<16x128xf32, #tpu.memory_space<vmem>>, %arg2: memref<128x256xbf16, #tpu.memory_space<vmem>>, %arg3: memref<1x256xf32, #tpu.memory_space<vmem>>, %arg4: memref<256x128xbf16, #tpu.memory_space<vmem>>, %arg5: memref<1x128xf32, #tpu.memory_space<vmem>>, %arg6: memref<128x128xbf16, #tpu.memory_space<vmem>>, %arg7: memref<1x128xf32, #tpu.memory_space<vmem>>, %arg8: memref<128x128xbf16, #tpu.memory_space<vmem>>, %arg9: memref<1x128xf32, #tpu.memory_space<vmem>>, %arg10: memref<16x128xf32, #tpu.memory_space<vmem>>) attributes {dimension_semantics = [#tpu.dimension_semantics<parallel>], iteration_bounds = array<i64: 2>, scalar_prefetch = 0 : i64, scratch_operands = 0 : i64, tpu.core_type = #tpu.core_type<tc>, window_params = [{transform_indices = @transform_0, window_bounds = array<i64: 16, 128>}, {pipeline_mode = #tpu.pipeline_mode<synchronous>, transform_indices = @transform_1, window_bounds = array<i64: 128, 256>}, {pipeline_mode = #tpu.pipeline_mode<synchronous>, transform_indices = @transform_2, window_bounds = array<i64: 1, 256>}, {pipeline_mode = #tpu.pipeline_mode<synchronous>, transform_indices = @transform_3, window_bounds = array<i64: 256, 128>}, {pipeline_mode = #tpu.pipeline_mode<synchronous>, transform_indices = @transform_4, window_bounds = array<i64: 1, 128>}, {pipeline_mode = #tpu.pipeline_mode<synchronous>, transform_indices = @transform_5, window_bounds = array<i64: 128, 128>}, {pipeline_mode = #tpu.pipeline_mode<synchronous>, transform_indices = @transform_6, window_bounds = array<i64: 1, 128>}, {pipeline_mode = #tpu.pipeline_mode<synchronous>, transform_indices = @transform_7, window_bounds = array<i64: 128, 128>}, {pipeline_mode = #tpu.pipeline_mode<synchronous>, transform_indices = @transform_8, window_bounds = array<i64: 1, 128>}, {transform_indices = @transform_9, window_bounds = array<i64: 16, 128>}]} {
    %c0 = arith.constant 0 : index
    %c0_0 = arith.constant 0 : index
    %0 = vector.load %arg1[%c0, %c0_0] : memref<16x128xf32, #tpu.memory_space<vmem>>, vector<16x128xf32>
    %1 = arith.truncf %0 : vector<16x128xf32> to vector<16x128xbf16>
    %c0_1 = arith.constant 0 : index
    %c0_2 = arith.constant 0 : index
    %2 = vector.load %arg2[%c0_1, %c0_2] : memref<128x256xbf16, #tpu.memory_space<vmem>>, vector<128x256xbf16>
    %cst = arith.constant dense<0.000000e+00> : vector<16x256xf32>
    %3 = tpu.matmul %1, %2, %cst {dimension_numbers = #tpu.dot_dimension_numbers<[1], [0], [0], [1], [0, 0, 1, 1], [], []>} : vector<16x128xbf16>, vector<128x256xbf16>, vector<16x256xf32> -> vector<16x256xf32>
    %c0_3 = arith.constant 0 : index
    %c0_4 = arith.constant 0 : index
    %4 = vector.load %arg3[%c0_3, %c0_4] : memref<1x256xf32, #tpu.memory_space<vmem>>, vector<1x256xf32>
    %5 = vector.broadcast %4 : vector<1x256xf32> to vector<16x256xf32>
    %6 = arith.addf %3, %5 : vector<16x256xf32>
    %cst_5 = arith.constant 0.000000e+00 : f32
    %7 = vector.broadcast %cst_5 : f32 to vector<16x256xf32>
    %8 = arith.maximumf %6, %7 : vector<16x256xf32>
    %9 = arith.truncf %8 : vector<16x256xf32> to vector<16x256xbf16>
    %c0_6 = arith.constant 0 : index
    %c0_7 = arith.constant 0 : index
    %10 = vector.load %arg4[%c0_6, %c0_7] : memref<256x128xbf16, #tpu.memory_space<vmem>>, vector<256x128xbf16>
    %cst_8 = arith.constant dense<0.000000e+00> : vector<16x128xf32>
    %11 = tpu.matmul %9, %10, %cst_8 {dimension_numbers = #tpu.dot_dimension_numbers<[1], [0], [0], [1], [0, 0, 1, 1], [], []>} : vector<16x256xbf16>, vector<256x128xbf16>, vector<16x128xf32> -> vector<16x128xf32>
    %c0_9 = arith.constant 0 : index
    %c0_10 = arith.constant 0 : index
    %12 = vector.load %arg5[%c0_9, %c0_10] : memref<1x128xf32, #tpu.memory_space<vmem>>, vector<1x128xf32>
    %13 = vector.broadcast %12 : vector<1x128xf32> to vector<16x128xf32>
    %14 = arith.addf %11, %13 : vector<16x128xf32>
    %cst_11 = arith.constant 0.000000e+00 : f32
    %15 = vector.broadcast %cst_11 : f32 to vector<16x128xf32>
    %16 = arith.maximumf %14, %15 : vector<16x128xf32>
    %17 = arith.truncf %16 : vector<16x128xf32> to vector<16x128xbf16>
    %c0_12 = arith.constant 0 : index
    %c0_13 = arith.constant 0 : index
    %18 = vector.load %arg6[%c0_12, %c0_13] : memref<128x128xbf16, #tpu.memory_space<vmem>>, vector<128x128xbf16>
    %cst_14 = arith.constant dense<0.000000e+00> : vector<16x128xf32>
    %19 = tpu.matmul %17, %18, %cst_14 {dimension_numbers = #tpu.dot_dimension_numbers<[1], [0], [0], [1], [0, 0, 1, 1], [], []>} : vector<16x128xbf16>, vector<128x128xbf16>, vector<16x128xf32> -> vector<16x128xf32>
    %c0_15 = arith.constant 0 : index
    %c0_16 = arith.constant 0 : index
    %20 = vector.load %arg7[%c0_15, %c0_16] : memref<1x128xf32, #tpu.memory_space<vmem>>, vector<1x128xf32>
    %21 = vector.broadcast %20 : vector<1x128xf32> to vector<16x128xf32>
    %22 = arith.addf %19, %21 : vector<16x128xf32>
    %cst_17 = arith.constant 0.000000e+00 : f32
    %23 = vector.broadcast %cst_17 : f32 to vector<16x128xf32>
    %24 = arith.maximumf %22, %23 : vector<16x128xf32>
    %25 = arith.truncf %24 : vector<16x128xf32> to vector<16x128xbf16>
    %c0_18 = arith.constant 0 : index
    %c0_19 = arith.constant 0 : index
    %26 = vector.load %arg8[%c0_18, %c0_19] : memref<128x128xbf16, #tpu.memory_space<vmem>>, vector<128x128xbf16>
    %cst_20 = arith.constant dense<0.000000e+00> : vector<16x128xf32>
    %27 = tpu.matmul %25, %26, %cst_20 {dimension_numbers = #tpu.dot_dimension_numbers<[1], [0], [0], [1], [0, 0, 1, 1], [], []>} : vector<16x128xbf16>, vector<128x128xbf16>, vector<16x128xf32> -> vector<16x128xf32>
    %c0_21 = arith.constant 0 : index
    %c0_22 = arith.constant 0 : index
    %28 = vector.load %arg9[%c0_21, %c0_22] : memref<1x128xf32, #tpu.memory_space<vmem>>, vector<1x128xf32>
    %29 = vector.broadcast %28 : vector<1x128xf32> to vector<16x128xf32>
    %30 = arith.addf %27, %29 : vector<16x128xf32>
    %c0_23 = arith.constant 0 : index
    %c0_24 = arith.constant 0 : index
    %31 = vector.load %arg10[%c0_23, %c0_24] : memref<16x128xf32, #tpu.memory_space<vmem>>, vector<16x128xf32>
    tpu.vector_store %arg10[%c0_23, %c0_24], %30 {strides = array<i32>} : memref<16x128xf32, #tpu.memory_space<vmem>>, vector<16x128xf32>,
    return
  }
  func.func @transform_0(%arg0: i32) -> (i32, i32) {
    %c0_i32 = arith.constant 0 : i32
    %c0_i32_0 = arith.constant 0 : i32
    return %arg0, %c0_i32 : i32, i32
  }
  func.func @transform_1(%arg0: i32) -> (i32, i32) {
    %c0_i32 = arith.constant 0 : i32
    %c0_i32_0 = arith.constant 0 : i32
    %c0_i32_1 = arith.constant 0 : i32
    return %c0_i32, %c0_i32_0 : i32, i32
  }
  func.func @transform_2(%arg0: i32) -> (i32, i32) {
    %c0_i32 = arith.constant 0 : i32
    %c0_i32_0 = arith.constant 0 : i32
    %c0_i32_1 = arith.constant 0 : i32
    return %c0_i32, %c0_i32_0 : i32, i32
  }
  func.func @transform_3(%arg0: i32) -> (i32, i32) {
    %c0_i32 = arith.constant 0 : i32
    %c0_i32_0 = arith.constant 0 : i32
    %c0_i32_1 = arith.constant 0 : i32
    return %c0_i32, %c0_i32_0 : i32, i32
  }
  func.func @transform_4(%arg0: i32) -> (i32, i32) {
    %c0_i32 = arith.constant 0 : i32
    %c0_i32_0 = arith.constant 0 : i32
    %c0_i32_1 = arith.constant 0 : i32
    return %c0_i32, %c0_i32_0 : i32, i32
  }
  func.func @transform_5(%arg0: i32) -> (i32, i32) {
    %c0_i32 = arith.constant 0 : i32
    %c0_i32_0 = arith.constant 0 : i32
    %c0_i32_1 = arith.constant 0 : i32
    return %c0_i32, %c0_i32_0 : i32, i32
  }
  func.func @transform_6(%arg0: i32) -> (i32, i32) {
    %c0_i32 = arith.constant 0 : i32
    %c0_i32_0 = arith.constant 0 : i32
    %c0_i32_1 = arith.constant 0 : i32
    return %c0_i32, %c0_i32_0 : i32, i32
  }
  func.func @transform_7(%arg0: i32) -> (i32, i32) {
    %c0_i32 = arith.constant 0 : i32
    %c0_i32_0 = arith.constant 0 : i32
    %c0_i32_1 = arith.constant 0 : i32
    return %c0_i32, %c0_i32_0 : i32, i32
  }
  func.func @transform_8(%arg0: i32) -> (i32, i32) {
    %c0_i32 = arith.constant 0 : i32
    %c0_i32_0 = arith.constant 0 : i32
    %c0_i32_1 = arith.constant 0 : i32
    return %c0_i32, %c0_i32_0 : i32, i32
  }
  func.func @transform_9(%arg0: i32) -> (i32, i32) {
    %c0_i32 = arith.constant 0 : i32
    %c0_i32_0 = arith.constant 0 : i32
    return %arg0, %c0_i32 : i32, i32
  }
}

</mosaic_0001>

<bundles_post_ra>
// kernel: tpu_custom_call.1
= control target key start
LH: loop header
LB: loop body
LE: loop exit
PB: predicated region body
PF: predicated region fallthrough
CT: control target
= control target key end

     0   :  { %s1935_s0 = inlined_call_operand.hbm [shape: f32[32,128], index: 0, kind: input, shape index: {}]   ;;  %s1936_s1 = inlined_call_operand.hbm [shape: bf16[128,256], index: 1, kind: input, shape index: {}]   ;;  %s1937_s2 = inlined_call_operand.vmem [shape: f32[1,256], index: 2, kind: input, shape index: {}]   ;;  %s1938_s3 = inlined_call_operand.hbm [shape: bf16[256,128], index: 3, kind: input, shape index: {}]   ;;  %s1939_s4 = inlined_call_operand.vmem [shape: f32[1,128], index: 4, kind: input, shape index: {}]   ;;  %s1940_s5 = inlined_call_operand.hbm [shape: bf16[128,128], index: 5, kind: input, shape index: {}]   ;;  %s1941_s6 = inlined_call_operand.vmem [shape: f32[1,128], index: 6, kind: input, shape index: {}]   ;;  %s1942_s7 = inlined_call_operand.hbm [shape: bf16[128,128], index: 7, kind: input, shape index: {}]   ;;  %s1943_s8 = inlined_call_operand.vmem [shape: f32[1,128], index: 8, kind: input, shape index: {}]   ;;  %s1944_s9 = inlined_call_operand.hbm [shape: f32[32,128], index: 9, kind: output, shape index: {}]  }
   0x1   :  { %1951 = sst [smem:[#allocation16_spill]] %s1936_s1 }
   0x2   :  { %1952 = sst [smem:[#allocation17_spill]] %s1938_s3 }
   0x3   :  { %1953 = sst [smem:[#allocation18_spill]] %s1940_s5 }
   0x4   :  { %14 = vsyncpa [#allocation3], 0 }
   0x5   :  { %16 = vsyncpa [#allocation3 + $0x1], 0 }
   0x6   :  { %17 = vsyncpa [#allocation6], 0 }
   0x7   :  { %18 = vsyncpa [#allocation9], 0 }
   0x8   :  { %19 = vsyncpa [#allocation4], 0 }
   0x9   :  { %21 = vsyncpa [#allocation4 + $0x1], 0  ;;  %s1683_s30 = smov 0   ;;  %s1685_s10 = smov 0  }
   0xa   :  { %s1687_s11 = smov 0   ;;  %s1689_s12 = smov 0  }
   0xb LB: > { %s1704_s13 = sadd.s32 4294967295, %s1616_s12   ;;  %s1105_s14 = sadd.s32 4294967294, %s1616_s12   ;;  %s1616_s12 = sphi %s1689_s12, %s1978_s12   ;;  %s1612_s11 = sphi %s1687_s11, %s1977_s11   ;;  %s1608_s10 = sphi %s1685_s10, %s1976_s10   ;;  %s1604_s30 = sphi %s1683_s30, %s1975_s30  }
   0xc   : > { %p47_p0 = scmp.ne.s32.totalorder %s1608_s10, %s1604_s30  ;;  %p1945_p1 = scmp.eq.s32.totalorder %s1704_s13, 0 }
   0xd   : > { %p245_p3 = scmp.eq.s32.totalorder %s1105_s14, 1  ;;  %p1106_p5 = scmp.ge.s32.totalorder %s1616_s12, 1 }
   0xe   : > { %p1713_p4 = por %p1945_p1, %p47_p0  ;;  %p252_p7 = scmp.lt.s32.totalorder %s1616_s12, 3 }
   0xf   : > { %p1718_p6 = por %p245_p3, %p47_p0  ;;  %s1618_s18 = smov [#allocation5]  }
  0x10   : > { %s1954_s15 = scalar_select %p1713_p4, 1, 0 }
  0x11   : > { %s1955_s16 = scalar_select %p1718_p6, 1, 0 }
  0x12   : > { %p1723_p8 = pnand %p1106_p5, %p252_p7  ;;  %s264_s19 = sshll.u32 %s1618_s18, 4  ;;  %s265_s19 = int_to_ptr.vmem [resolvable:$true] %s264_s19 }
  0x13   : > { %s1619_s21 = smov [#allocation8]   ;;  %s1423_s23 = scalar_lea.vmem %s265_s19, 2048 }
  0x14   : > { %s1956_s17 = scalar_select %p1723_p8, 1, 0 }
  0x15   : > { %p1280_p9 = pneg %p1723_p8  ;;  %s296_s22 = sshll.u32 %s1619_s21, 4  ;;  %s297_s22 = int_to_ptr.vmem [resolvable:$true] %s296_s22 }
  0x16   : > { %p1424_p13 = scmp.ne.s32.totalorder %s265_s19, %s1423_s23  ;;  %p1431_p5 = scmp.lt.s32.totalorder %s265_s19, %s265_s19 }
  0x17   : > { %p1732_p11 = pnand %p1280_p9, %p1945_p1  ;;  %p1432_p7 = scmp.lt.s32.totalorder %s1423_s23, %s1423_s23 }
  0x19   : > { %p1414_p12 = pneg %p1732_p11  ;;  %p1433_p10 = por %p1432_p7, %p1431_p5 }
  0x1b   : > { %p1426_p0 = pnand %p1424_p13, %p1414_p12 }
  0x1d   : > { %p1427_p3 = pneg %p1426_p0 }
  0x1f   : > { %p1434_p2 = pnand %p1433_p10, %p1427_p3 }
  0x21   : > { %1437 = shalt.err (!%p1434_p2)
}
  0x22   : > { %s1946_s24 = smov 128   ;;  %s1947_s25 = smov 8  }
  0x23   : > { %s1958_s1 = sld [smem:[#allocation16_spill]]  ;;  %s1622_s28 = smov [#allocation7]  }
  0x24   : > { %s280_s29 = sshll.u32 %s1622_s28, 4  ;;  %s1449_s14 = scalar_lea.vmem %s297_s22, 1024  ;;  %s281_s29 = int_to_ptr.vmem [resolvable:$true] %s280_s29 }
  0x25   : > { %p1450_p9 = scmp.ne.s32.totalorder %s297_s22, %s1449_s14  ;;  %p1457_p13 = scmp.lt.s32.totalorder %s297_s22, %s297_s22 }
  0x26   : > { %p1458_p0 = scmp.lt.s32.totalorder %s1449_s14, %s1449_s14 }
  0x27   : > { %p1452_p2 = pnand %p1450_p9, %p1414_p12 }
  0x28   : > { %p1459_p3 = por %p1458_p0, %p1457_p13 }
  0x29   : > { %1283 = dma.hbm_to_vmem [thread:$0]  (!%p1732_p11), %s1958_s1, 2048, %s265_s19, [#allocation6], %s1946_s24, %s1946_s24, %s1947_s25  }
  0x2a   : > { %p1453_p10 = pneg %p1452_p2 }
  0x2c   : > { %p1460_p5 = pnand %p1459_p3, %p1453_p10 }
  0x2e   : > { %1463 = shalt.err (!%p1460_p5)
}
  0x2f   : > { %s1623_s18 = smov 64   ;;  %s1624_s21 = smov 4  }
  0x30   : > { %s1959_s5 = sld [smem:[#allocation18_spill]]  ;;  %s1475_s26 = scalar_lea.vmem %s281_s29, 2048 }
  0x31   : > { %p1476_p7 = scmp.ne.s32.totalorder %s281_s29, %s1475_s26  ;;  %p1483_p1 = scmp.lt.s32.totalorder %s281_s29, %s281_s29 }
  0x32   : > { %p1484_p13 = scmp.lt.s32.totalorder %s1475_s26, %s1475_s26 }
  0x33   : > { %p1478_p9 = pnand %p1476_p7, %p1414_p12 }
  0x34   : > { %p1485_p10 = por %p1484_p13, %p1483_p1 }
  0x35   : > { %p1479_p2 = pneg %p1478_p9 }
  0x36   : > { %1289 = dma.hbm_to_vmem [thread:$0]  (!%p1732_p11), %s1959_s5, 1024, %s297_s22, [#allocation9], %s1623_s18, %s1623_s18, %s1624_s21  }
  0x37   : > { %p1486_p0 = pnand %p1485_p10, %p1479_p2 }
  0x39   : > { %1489 = shalt.err (!%p1486_p0)
}
  0x3a   : > { %s1960_s3 = sld [smem:[#allocation17_spill]]  ;;  %s1625_s22 = smov [#allocation10]  }
  0x3b   : > { %s312_s14 = sshll.u32 %s1625_s22, 4  ;;  %s313_s14 = int_to_ptr.vmem [resolvable:$true] %s312_s14 }
  0x3c   : > { %s1501_s19 = scalar_lea.vmem %s313_s14, 1024  ;;  %p1509_p9 = scmp.lt.s32.totalorder %s313_s14, %s313_s14 }
  0x3d   : > { %p1502_p3 = scmp.ne.s32.totalorder %s313_s14, %s1501_s19  ;;  %p1510_p1 = scmp.lt.s32.totalorder %s1501_s19, %s1501_s19 }
  0x3f   : > { %p1504_p5 = pnand %p1502_p3, %p1414_p12  ;;  %p1511_p2 = por %p1510_p1, %p1509_p9 }
  0x40   : > { %1286 = dma.hbm_to_vmem [thread:$0]  (!%p1732_p11), %s1960_s3, 2048, %s281_s29, [#allocation6], %s1623_s18, %s1623_s18, %s1624_s21  }
  0x41   : > { %p1505_p7 = pneg %p1504_p5 }
  0x43   : > { %p1512_p13 = pnand %p1511_p2, %p1505_p7 }
  0x45   : > { %1515 = shalt.err (!%p1512_p13)
}
  0x46   : > { %1292 = dma.hbm_to_vmem [thread:$0]  (!%p1732_p11), %s1942_s7, 1024, %s313_s14, [#allocation9], %s1623_s18, %s1623_s18, %s1624_s21  }
  0x47   : > { %s1774_s29 = sadd.s32 1, %s1616_s12   ;;  %s34_s27 = sadd.s32 1, %s1612_s11 }
  0x48   : > { %s31_s20 = ssub.s32 %s1616_s12, %s1774_s29  ;;  %p41_p12 = scmp.ne.s32.totalorder %s1612_s11, %s1608_s10 }
  0x49   : > { %p32_p10 = scmp.eq.s32.totalorder %s31_s20, 0  ;;  %p42_p0 = scmp.eq.s32.totalorder %s1616_s12, 0 }
  0x4a   : > { %p1961_p3 = scmp.eq.s32.totalorder %s1704_s13, 1  ;;  %p1305_p7 = scmp.lt.s32.totalorder %s1616_s12, 2 }
  0x4b   : > { %s1790_s22 = scalar_select %p32_p10, %s1612_s11, %s34_s27  }
  0x4c   : > { %p1784_p5 = por %p1961_p3, %p41_p12  ;;  %p43_p9 = por %p42_p0, %p41_p12 }
  0x4d   : > { %s329_s19 = sand.u32 1, %s1612_s11   ;;  %s1178_s18 = sshll.u32 %s1616_s12, 8 }
  0x4e   : > { %s1962_s28 = scalar_select %p1784_p5, 1, 0 }
  0x4f   : > { %s1112_s23 = sshll.u32 %s329_s19, 4  ;;  %s1797_s26 = scalar_lea.hbm %s1935_s0, %s1178_s18 }
  0x50   : > { %s333_s20 = scalar_lea.vmem [#allocation2], %s1112_s23  ;;  %p1801_p11 = pnand %p1305_p7, %p43_p9 }
  0x51   : > { %s340_s24 = sshll.u32 %s333_s20, 4  ;;  %s1805_s27 = scalar_lea.sflag [#allocation3], %s329_s19  ;;  %s1799_s24 = int_to_ptr.vmem [resolvable:$true] %s340_s24 }
  0x52   : > { %s1516_s1 = scalar_lea.hbm %s1797_s26, 256  ;;  %p1518_p2 = pneg %p1801_p11 }
  0x53   : > { %p1517_p1 = scmp.ne.s32.totalorder %s1797_s26, %s1516_s1  ;;  %s1521_s23 = scalar_lea.hbm %s1935_s0, 512 }
  0x54   : > { %p1522_p10 = scmp.lt.s32.totalorder %s1797_s26, %s1935_s0  ;;  %p1523_p0 = scmp.lt.s32.totalorder %s1521_s23, %s1516_s1 }
  0x55   : > { %p1519_p13 = pnand %p1518_p2, %p1517_p1 }
  0x56   : > { %p1524_p3 = por %p1523_p0, %p1522_p10 }
  0x57   : > { %p1520_p12 = pneg %p1519_p13 }
  0x59   : > { %p1525_p7 = pnand %p1524_p3, %p1520_p12 }
  0x5b   : > { %1528 = shalt.err (!%p1525_p7)
}
  0x5c   : > { %s1529_s19 = scalar_lea.vmem %s1799_s24, 256  ;;  %s1626_s3 = smov [#allocation2]  }
  0x5d   : > { %p1530_p9 = scmp.ne.s32.totalorder %s1799_s24, %s1529_s19  ;;  %s1534_s5 = sshll.u32 %s1626_s3, 4  ;;  %s1535_s5 = int_to_ptr.vmem [resolvable:$false] %s1534_s5 }
  0x5e   : > { %s1536_s18 = scalar_lea.vmem %s1535_s5, 512  ;;  %p1537_p13 = scmp.lt.s32.totalorder %s1799_s24, %s1535_s5 }
  0x5f   : > { %p1532_p6 = pnand %p1530_p9, %p1518_p2  ;;  %p1538_p5 = scmp.lt.s32.totalorder %s1536_s18, %s1529_s19 }
  0x61   : > { %p1533_p1 = pneg %p1532_p6  ;;  %p1539_p4 = por %p1538_p5, %p1537_p13 }
  0x63   : > { %p1540_p8 = pnand %p1539_p4, %p1533_p1 }
  0x65   : > { %1543 = shalt.err (!%p1540_p8)
}
  0x66   : > { %s1964_s1 = smov 8   ;;  %s1965_s21 = smov 128  }
  0x67   : > { %1296 = dma.hbm_to_vmem [thread:$0]  (!%p1801_p11), %s1797_s26, 256, %s1799_s24, %s1805_s27, %s1965_s21, %s1965_s21, %s1964_s1  }
  0x68   : > { %p1966_p6 = scmp.ne.s32.totalorder %s1956_s17, 0 }
  0x69   : > { %s1832_s3 = sand.u32 (!%p1966_p6), 1, %s1608_s10   ;;  %p1967_p4 = scmp.ne.s32.totalorder (!%p1966_p6), %s1954_s15, 0 }
  0x6a   : > { %352 = sbr.rel (%p1966_p6) target bundleno = 981 (0x3d5), region = 56  ;;  %s1116_s5 = sshll.u32 (!%p1966_p6), %s1832_s3, 4 }
  0x6b   : > { %s355_s23 = scalar_lea.sflag (!%p1966_p6), [#allocation3], %s1832_s3  ;;  %s1838_s25 = scalar_lea.vmem (!%p1966_p6), [#allocation2], %s1116_s5 }
  0x6f   : > { %1587 = dma.done.wait (%p1967_p4), %s355_s23, 256  }
  0x70   : > { %1589 = vsyncadd (%p1967_p4), %s355_s23, 4294967040  ;;  %p1968_p8 = scmp.eq.s32.totalorder %s1704_s13, 0 }
  0x72   : > { %1591 = dma.done.wait (%p1968_p8), [#allocation6], 4096   ;;  %p1969_p5 = pmov %p1968_p8 }
  0x74   : > { %1593 = vsyncadd (%p1969_p5), [#allocation6], 4294963200  ;;  %p1970_p11 = pmov %p1969_p5 }
  0x75   : > { %p1971_p2 = pmov %p1969_p5 }
  0x76   : > { %1595 = dma.done.wait (%p1970_p11), [#allocation9], 2048  }
  0x77   : > { %1597 = vsyncadd (%p1971_p2), [#allocation9], 4294965248  ;;  %v1627_v0 = vmov 0   ;;  %v1356_v1 = vld [vmem:[#allocation5 + $0x74] ss:$8 sps:$4 sm:$0xff]   ;;  %v1384_v16 = vld [vmem:[#allocation7 + $0x68] sm:$0xff]   ;;  %v433_v41 = vlaneseq }
  0x78   : > { %555 = vmatprep.mubr.bf16.mxu0 %v1627_v0  ;;  %v1358_v2 = vld [vmem:[#allocation5 + $0x70] ss:$8 sps:$4 sm:$0xff]   ;;  %523 = vmatprep.subr.bf16.mxu0 %v1356_v1  ;;  %v1359_v3 = vld [vmem:[#allocation5 + $0x64] ss:$8 sps:$4 sm:$0xff]   ;;  %v1361_v4 = vld [vmem:[#allocation5 + $0x60] ss:$8 sps:$4 sm:$0xff]  }
  0x79   : > { %524 = vmatpush1.bf16.msra.mxu0 %v1358_v2  ;;  %v1362_v5 = vld [vmem:[#allocation5 + $0x54] ss:$8 sps:$4 sm:$0xff]   ;;  %v1364_v6 = vld [vmem:[#allocation5 + $0x50] ss:$8 sps:$4 sm:$0xff]   ;;  %v1365_v7 = vld [vmem:[#allocation5 + $0x44] ss:$8 sps:$4 sm:$0xff]  }
  0x7a   : > { %525 = vmatprep.subr.bf16.mxu0 %v1359_v3  ;;  %v1367_v8 = vld [vmem:[#allocation5 + $0x40] ss:$8 sps:$4 sm:$0xff]   ;;  %v1368_v9 = vld [vmem:[#allocation5 + $0x34] ss:$8 sps:$4 sm:$0xff]   ;;  %v1370_v11 = vld [vmem:[#allocation5 + $0x30] ss:$8 sps:$4 sm:$0xff]  }
  0x7b   : > { %v1380_v10 = vld [vmem:[#allocation7 + $0x78] sm:$0xff]   ;;  %v1371_v13 = vld [vmem:[#allocation5 + $0x24] ss:$8 sps:$4 sm:$0xff]   ;;  %v1382_v14 = vld [vmem:[#allocation7 + $0x70] sm:$0xff]   ;;  %v1628_v37 = vmov 0.0   ;;  %v434_v42 = vshrl.u32 %v433_v41, 7 }
  0x7c   : > { %v1381_v12 = vld [vmem:[#allocation7 + $0x38] sm:$0xff]   ;;  %1180 = vmatprep.subr.bf16.mxu1 %v1380_v10  ;;  %v1383_v15 = vld [vmem:[#allocation7 + $0x30] sm:$0xff]   ;;  %v1373_v17 = vld [vmem:[#allocation5 + $0x20] ss:$8 sps:$4 sm:$0xff]   ;;  %vm1629_vm0 = vmmov 0   ;;  %s408_s18 = scalar_lea.vmem [#allocation11], %s1116_s5 }
  0x7d   : > { %526 = vmatpush1.bf16.msra.mxu0 %v1361_v4  ;;  %1181 = vmatpush3.bf16.msra.mxu1 %v1381_v12  ;;  %v1374_v18 = vld [vmem:[#allocation5 + $0x14] ss:$8 sps:$4 sm:$0xff]   ;;  %v1385_v19 = vld [vmem:[#allocation7 + $0x28] sm:$0xff]   ;;  %v1386_v20 = vld [vmem:[#allocation7 + $0x60] sm:$0xff]   ;;  %v439_v43 = vsub.s32 1, %v434_v42  ;;  %v435_v44 = vsub.s32 0, %v434_v42 }
  0x7e   : > { %527 = vmatprep.subr.bf16.mxu0 %v1362_v5  ;;  %1182 = vmatprep.subr.bf16.mxu1 %v1382_v14  ;;  %v1376_v21 = vld [vmem:[#allocation5 + $0x10] ss:$8 sps:$4 sm:$0xff]   ;;  %v1387_v22 = vld [vmem:[#allocation7 + $0x20] sm:$0xff]   ;;  %v1392_v32 = vld [vmem:[#allocation7 + $0x48] sm:$0xff]   ;;  %s994_s1 = sshll.u32 %s408_s18, 4  ;;  %s1179_s21 = sshll.u32 %s1704_s13, 8  ;;  %s1887_s1 = int_to_ptr.vmem [resolvable:$true] %s994_s1 }
  0x7f   : > { %v1377_v23 = vld [vmem:[#allocation5 + $0x4] ss:$8 sps:$4 sm:$0xff]   ;;  %v1388_v24 = vld [vmem:[#allocation7 + $0x58] sm:$0xff]   ;;  %v1379_v25 = vld [vmem:[#allocation5] ss:$8 sps:$4 sm:$0xff]   ;;  %s1892_s15 = scalar_lea.hbm %s1944_s9, %s1179_s21  ;;  %s981_s5 = scalar_lea.sflag [#allocation4], %s1832_s3 }
  0x80   : > { %v412_v26 = vld [vmem:[%s1838_s25] sm:$0xff]  ;;  %v413_v27 = vld [vmem:[%s1838_s25 + $0x8] sm:$0xff]  ;;  %s1544_s17 = scalar_lea.vmem %s1887_s1, 256  ;;  %p1972_p10 = scmp.ne.s32.totalorder %s1962_s28, 0 }
  0x81   : > { %528 = vmatpush1.bf16.msra.mxu0 %v1364_v6  ;;  %1183 = vmatpush3.bf16.msra.mxu1 %v1383_v15  ;;  %v1389_v28 = vld [vmem:[#allocation7 + $0x18] sm:$0xff]   ;;  %v414_v29 = vpack.c.bf16 %v413_v27, %v412_v26  ;;  %v1390_v30 = vld [vmem:[#allocation7 + $0x50] sm:$0xff]   ;;  %v1393_v33 = vld [vmem:[#allocation7 + $0x8] sm:$0xff]   ;;  %p1545_p12 = scmp.ne.s32.totalorder %s1887_s1, %s1544_s17  ;;  %s1630_s13 = smov [#allocation11]  }
  0x82   : > { %529 = vmatprep.subr.bf16.mxu0 %v1365_v7  ;;  %1184 = vmatprep.subr.bf16.mxu1 %v1384_v16  ;;  %v1391_v31 = vld [vmem:[#allocation7 + $0x10] sm:$0xff]   ;;  %v1394_v34 = vld [vmem:[#allocation7 + $0x40] sm:$0xff]   ;;  %v1396_v36 = vld [vmem:[#allocation8 + $0x38] sm:$0xff]   ;;  %s1548_s24 = sshll.u32 %s1630_s13, 4  ;;  %s1549_s24 = int_to_ptr.vmem [resolvable:$false] %s1548_s24 }
  0x83   : > { %v1395_v35 = vld [vmem:[#allocation7] sm:$0xff]   ;;  %v1397_v38 = vld [vmem:[#allocation8 + $0x30] sm:$0xff]   ;;  %v1398_v39 = vld [vmem:[#allocation8 + $0x28] sm:$0xff]   ;;  %p1546_p0 = pnand %p1545_p12, %p1972_p10  ;;  %s1550_s26 = scalar_lea.vmem %s1549_s24, 512 }
  0x84   : > { %v1399_v40 = vld [vmem:[#allocation8 + $0x20] sm:$0xff]   ;;  %v1400_v62 = vld [vmem:[#allocation8 + $0x18] sm:$0xff]   ;;  %v1401_v63 = vld [vmem:[#allocation8 + $0x10] sm:$0xff]   ;;  %p1551_p7 = scmp.lt.s32.totalorder %s1887_s1, %s1549_s24  ;;  %p1552_p9 = scmp.lt.s32.totalorder %s1550_s26, %s1544_s17 }
  0x85   : > { %530 = vmatpush1.bf16.msra.mxu0 %v1367_v8  ;;  %1185 = vmatpush3.bf16.msra.mxu1 %v1385_v19  ;;  %v431_v45 = vld [vmem:[%s1937_s2] sm:$0x3]  ;;  %v1402_v0 = vld [vmem:[#allocation8 + $0x8] sm:$0xff]   ;;  %v1404_v2 = vld [vmem:[#allocation10 + $0x38] sm:$0xff]   ;;  %p1547_p3 = pneg %p1546_p0 }
  0x86   : > { %531 = vmatprep.subr.bf16.mxu0 %v1368_v9  ;;  %1186 = vmatprep.subr.bf16.mxu1 %v1386_v20  ;;  %v440_v47 = vrot.slane %v431_v45, %v439_v43  ;;  %v436_v48 = vrot.slane %v431_v45, %v435_v44  ;;  %v1403_v1 = vld [vmem:[#allocation8] sm:$0xff]   ;;  %v1405_v3 = vld [vmem:[#allocation10 + $0x30] sm:$0xff]   ;;  %v1406_v4 = vld [vmem:[#allocation10 + $0x28] sm:$0xff]   ;;  %p1553_p1 = por %p1552_p9, %p1551_p7 }
  0x87   : > { %v1407_v5 = vld [vmem:[#allocation10 + $0x20] sm:$0xff]   ;;  %v1408_v6 = vld [vmem:[#allocation10 + $0x18] sm:$0xff]   ;;  %v1409_v19 = vld [vmem:[#allocation10 + $0x10] sm:$0xff]  }
  0x88   : > { %v1138_v10 = vld [vmem:[%s1939_s4] ss:$0 sm:$0xff]  ;;  %v1410_v20 = vld [vmem:[#allocation10 + $0x8] sm:$0xff]   ;;  %p1554_p13 = pnand %p1553_p1, %p1547_p3 }
  0x89   : > { %532 = vmatpush1.bf16.msra.mxu0 %v1370_v11  ;;  %1187 = vmatpush3.bf16.msra.mxu1 %v1387_v22  ;;  %v1155_v22 = vld [vmem:[%s1941_s6] ss:$0 sm:$0xff] }
  0x8a   : > { %533 = vmatprep.subr.bf16.mxu0 %v1371_v13  ;;  %1188 = vmatprep.subr.bf16.mxu1 %v1388_v24 }
  0x8d   : > { %534 = vmatpush1.bf16.msra.mxu0 %v1373_v17  ;;  %1189 = vmatpush3.bf16.msra.mxu1 %v1389_v28 }
  0x8e   : > { %535 = vmatprep.subr.bf16.mxu0 %v1374_v18  ;;  %1190 = vmatprep.subr.bf16.mxu1 %v1390_v30 }
  0x91   : > { %536 = vmatpush1.bf16.msra.mxu0 %v1376_v21  ;;  %1191 = vmatpush3.bf16.msra.mxu1 %v1391_v31  ;;  %v1411_v21 = vld [vmem:[#allocation10] sm:$0xff]  }
  0x92   : > { %537 = vmatprep.subr.bf16.mxu0 %v1377_v23  ;;  %1192 = vmatprep.subr.bf16.mxu1 %v1392_v32  ;;  %v1164_v32 = vld [vmem:[%s1943_s8] ss:$0 sm:$0xff] }
  0x95   : > { %538 = vmatpush1.bf16.msra.mxu0 %v1379_v25  ;;  %1193 = vmatpush3.bf16.msra.mxu1 %v1393_v33 }
  0x96   : > { %1194 = vmatprep.subr.bf16.mxu1 %v1394_v34  ;;  %1220 = vmatprep.subr.bf16.mxu0 %v1628_v37 }
  0x98   : > { %556 = vmatmul.mubr.bf16.vlgmr.msra.gmra.mxu0 %v414_v29 }
  0x99   : > { %1195 = vmatpush3.bf16.msra.mxu1 %v1395_v35  ;;  %1221 = vmatpush3.bf16.msra.mxu0 %v1396_v36 }
  0x9a   : > { %1240 = vmatprep.subr.bf16.mxu1 %v1628_v37  ;;  %1222 = vmatprep.subr.bf16.mxu0 %v1628_v37 }
  0x9b   : > { %1236 = vmatprep.mubr.msk.bf16.mxu0 %vm1629_vm0, %v1628_v37 }
  0x9d   : > { %1223 = vmatpush3.bf16.msra.mxu0 %v1397_v38 }
  0x9e   : > { %1224 = vmatprep.subr.bf16.mxu0 %v1628_v37 }
  0xa1   : > { %1225 = vmatpush3.bf16.msra.mxu0 %v1398_v39 }
  0xa2   : > { %1226 = vmatprep.subr.bf16.mxu0 %v1628_v37 }
  0xa5   : > { %1227 = vmatpush3.bf16.msra.mxu0 %v1399_v40 }
  0xa6   : > { %1228 = vmatprep.subr.bf16.mxu0 %v1628_v37 }
  0xa9   : > { %1229 = vmatpush3.bf16.msra.mxu0 %v1400_v62 }
  0xaa   : > { %1230 = vmatprep.subr.bf16.mxu0 %v1628_v37 }
  0xad   : > { %1231 = vmatpush3.bf16.msra.mxu0 %v1401_v63 }
  0xae   : > { %1232 = vmatprep.subr.bf16.mxu0 %v1628_v37 }
  0xb1   : > { %1233 = vmatpush3.bf16.msra.mxu0 %v1402_v0 }
  0xb2   : > { %1234 = vmatprep.subr.bf16.mxu0 %v1628_v37 }
  0xb5   : > { %1235 = vmatpush3.bf16.msra.mxu0 %v1403_v1 }
 0x158   : > { %v557_v46 = vpop.f32.mrf.mxu0 }
 0x159   : > { %v558_v53 = vadd.f32 %v557_v46, %v436_v48 }
 0x15a   : > { %v559_v49 = vpop.f32.mrf.mxu0 }
 0x15b   : > { %v560_v51 = vadd.f32 %v559_v49, %v440_v47  ;;  %v566_v59 = vmax.f32 %v558_v53, 0.0 }
 0x15c   : > { %v561_v50 = vpop.f32.mrf.mxu0 }
 0x15d   : > { %v562_v52 = vadd.f32 %v561_v50, %v436_v48  ;;  %v567_v57 = vmax.f32 %v560_v51, 0.0 }
 0x15e   : > { %v563_v54 = vpop.f32.mrf.mxu0 }
 0x15f   : > { %v564_v55 = vadd.f32 %v563_v54, %v440_v47  ;;  %v568_v56 = vmax.f32 %v562_v52, 0.0 }
 0x161   : > { %v569_v58 = vmax.f32 %v564_v55, 0.0  ;;  %v570_v61 = vpack.c.bf16 %v568_v56, %v566_v59 }
 0x163   : > { %v571_v60 = vpack.c.bf16 %v569_v58, %v567_v57 }
 0x165   : > { %739 = vmatprep.mubr.bf16.mxu1 %v571_v60 }
 0x166   : > { %740 = vmatmul.mubr.bf16.vlgmr.msra.gmra.mxu1 %v570_v61 }
 0x167   : > { %1256 = vmatprep.mubr.msk.bf16.mxu1 %vm1629_vm0, %v1628_v37  ;;  %1241 = vmatpush3.bf16.msra.mxu1 %v1404_v2 }
 0x168   : > { %1242 = vmatprep.subr.bf16.mxu1 %v1628_v37 }
 0x16b   : > { %1243 = vmatpush3.bf16.msra.mxu1 %v1405_v3 }
 0x16c   : > { %1244 = vmatprep.subr.bf16.mxu1 %v1628_v37 }
 0x16f   : > { %1245 = vmatpush3.bf16.msra.mxu1 %v1406_v4 }
 0x170   : > { %1246 = vmatprep.subr.bf16.mxu1 %v1628_v37 }
 0x173   : > { %1247 = vmatpush3.bf16.msra.mxu1 %v1407_v5 }
 0x174   : > { %1248 = vmatprep.subr.bf16.mxu1 %v1628_v37 }
 0x177   : > { %1249 = vmatpush3.bf16.msra.mxu1 %v1408_v6 }
 0x178   : > { %1250 = vmatprep.subr.bf16.mxu1 %v1628_v37 }
 0x17b   : > { %1251 = vmatpush3.bf16.msra.mxu1 %v1409_v19 }
 0x17c   : > { %1252 = vmatprep.subr.bf16.mxu1 %v1628_v37 }
 0x17f   : > { %1253 = vmatpush3.bf16.msra.mxu1 %v1410_v20 }
 0x180   : > { %1254 = vmatprep.subr.bf16.mxu1 %v1628_v37 }
 0x183   : > { %1255 = vmatpush3.bf16.msra.mxu1 %v1411_v21 }
 0x226   : > { %v1196_v7 = vpop.f32.mrf.mxu1 }
 0x228   : > { %v1197_v8 = vpop.f32.mrf.mxu1 }
 0x229   : > { %v1198_v9 = vadd.f32 %v1197_v8, %v1196_v7 }
 0x22a   : > { %v1199_v11 = vpop.f32.mrf.mxu1 }
 0x22b   : > { %v742_v13 = vadd.f32 %v1198_v9, %v1138_v10 }
 0x22c   : > { %v1200_v12 = vpop.f32.mrf.mxu1 }
 0x22d   : > { %v1201_v14 = vadd.f32 %v1200_v12, %v1199_v11  ;;  %v748_v16 = vmax.f32 %v742_v13, 0.0 }
 0x22f   : > { %v745_v15 = vadd.f32 %v1201_v14, %v1138_v10 }
 0x231   : > { %v749_v17 = vmax.f32 %v745_v15, 0.0 }
 0x233   : > { %v750_v18 = vpack.c.bf16 %v749_v17, %v748_v16 }
 0x235   : > { %1237 = vmatmul.mubr.bf16.vlgmr.msra.gmra.mxu0 %v750_v18 }
 0x2f5   : > { %v856_v23 = vpop.f32.mrf.mxu0 }
 0x2f6   : > { %v857_v25 = vadd.f32 %v1155_v22, %v856_v23 }
 0x2f7   : > { %v1238_v24 = vpop.f32.mrf.mxu0 }
 0x2f8   : > { %v863_v29 = vmax.f32 %v857_v25, 0.0 }
 0x2f9   : > { %v859_v26 = vpop.f32.mrf.mxu0 }
 0x2fa   : > { %v860_v27 = vadd.f32 %v1155_v22, %v859_v26 }
 0x2fb   : > { %v1239_v28 = vpop.f32.mrf.mxu0 }
 0x2fc   : > { %v864_v30 = vmax.f32 %v860_v27, 0.0 }
 0x2fe   : > { %v865_v31 = vpack.c.bf16 %v864_v30, %v863_v29 }
 0x300   : > { %1257 = vmatmul.mubr.bf16.vlgmr.msra.gmra.mxu1 %v865_v31 }
 0x3c0   : > { %v971_v33 = vpop.f32.mrf.mxu1 }
 0x3c1   : > { %v972_v34 = vadd.f32 %v1164_v32, %v971_v33 }
 0x3c2   : > { %v1258_v35 = vpop.f32.mrf.mxu1 }
 0x3c3   : > { %978 = vst [vmem:[%s408_s18] sm:$0xff] %v972_v34 }
 0x3c4   : > { %v974_v36 = vpop.f32.mrf.mxu1 }
 0x3c5   : > { %v975_v37 = vadd.f32 %v1164_v32, %v974_v36 }
 0x3c6   : > { %v1259_v38 = vpop.f32.mrf.mxu1 }
 0x3c7   : > { %979 = vst [vmem:[%s408_s18 + $0x8] sm:$0xff] %v975_v37 }
 0x3c8   : > { %1557 = shalt.err (!%p1554_p13)
}
 0x3c9   : > { %s1558_s27 = scalar_lea.hbm %s1892_s15, 256  ;;  %s1562_s19 = scalar_lea.hbm %s1944_s9, 512 }
 0x3ca   : > { %p1559_p6 = scmp.ne.s32.totalorder %s1892_s15, %s1558_s27  ;;  %p1563_p5 = scmp.lt.s32.totalorder %s1892_s15, %s1944_s9 }
 0x3cb   : > { %p1564_p11 = scmp.lt.s32.totalorder %s1562_s19, %s1558_s27 }
 0x3cc   : > { %p1560_p4 = pnand %p1559_p6, %p1972_p10 }
 0x3cd   : > { %p1565_p2 = por %p1564_p11, %p1563_p5 }
 0x3ce   : > { %p1561_p8 = pneg %p1560_p4 }
 0x3d0   : > { %p1566_p12 = pnand %p1565_p2, %p1561_p8 }
 0x3d2   : > { %1569 = shalt.err (!%p1566_p12)
}
 0x3d3   : > { %s1631_s23 = smov 128   ;;  %s1632_s25 = smov 8  }
 0x3d4   : > { %1278 = dma.vmem_to_hbm [thread:$0]  (%p1972_p10), %s1887_s1, 256, %s1892_s15, %s981_s5, %s1631_s23, %s1631_s23, %s1632_s25  }
 0x3d5 PF: > { %s1009_s17 = sand.u32 1, %s1604_s30   ;;  %p1973_p0 = scmp.ne.s32.totalorder %s1955_s16, 0 }
 0x3d6   : > { %p1974_p3 = scmp.ge.s32.totalorder %s1616_s12, 2  ;;  %s1010_s13 = scalar_lea.sflag [#allocation4], %s1009_s17 }
 0x3d8   : > { %p1298_p7 = pnand %p1974_p3, %p1973_p0 }
 0x3da   : > { %p1299_p9 = pneg %p1298_p7 }
 0x3dc   : > { %1599 = dma.done.wait (%p1299_p9), %s1010_s13, 256  }
 0x3dd   : > { %1601 = vsyncadd (%p1299_p9), %s1010_s13, 4294967040  ;;  %p24_p1 = scmp.ge.s32.totalorder %s1774_s29, 4   ;;  %s1975_s30 = smov %s1608_s10 }
 0x3de   : > { %s1976_s10 = smov %s1612_s11  ;;  %s1977_s11 = smov %s1790_s22 }
 0x3df   : > { %s1978_s12 = smov %s1774_s29  ;;  %26 = sbr.rel (!%p24_p1) target bundleno = 11 (0xb), region = 117 }
 0x3e4   :  { %1015 = vsyncpa [#allocation3], 1 }
 0x3e5   :  { %1017 = vsyncpa [#allocation3 + $0x1], 1 }
 0x3e6   :  { %1018 = vsyncpa [#allocation6], 1 }
 0x3e7   :  { %1019 = vsyncpa [#allocation9], 1 }
 0x3e8   :  { %1020 = vsyncpa [#allocation4], 1 }
 0x3e9   :  { %1022 = vsyncpa [#allocation4 + $0x1], 1 }

</bundles_post_ra>
